<compile_context>
chip_gen: v6e
topology: v6e:2x2x1
jax: 0.10.0
libtpu: 0.0.40
codegen_flags: <defaults>
</compile_context>

<pallas_src>
import functools

import jax
import jax.numpy as jnp
import numpy as np
from jax.experimental import pallas as pl
from jax.experimental.pallas import tpu as pltpu

ACTION_N = 4          # number of discrete actions for the imitation policy
IN_FEATURES = 2
HIDDEN = 128

DEFAULT_BLOCK_B = 2048   # batch tile (multiple of 8); ~1.2 MiB working set -> fits all gens


def _round_up(x, m):
    return (x + m - 1) // m * m


def mlp_kernel(x_ref, w1_ref, b1_ref, w2_ref, b2_ref, o_ref):
    x = x_ref[...]                                   # (tb, 2) f32
    # Layer 1: K=2 contraction as two broadcasted VPU FMAs (MXU irrelevant here),
    # then bias + ReLU.  All f32.
    h = x[:, 0:1] * w1_ref[0:1, :] + x[:, 1:2] * w1_ref[1:2, :] + b1_ref[...]
    h = jnp.maximum(h, 0.0)                          # (tb, 128)
    # Layer 2: (tb, 128) @ (128, ACTION_N) on the MXU with f32 accumulation, + bias.
    out = jnp.dot(h, w2_ref[...], preferred_element_type=jnp.float32) + b2_ref[...]
    o_ref[...] = out.astype(o_ref.dtype)             # narrow (tb, 4) store


@functools.partial(jax.jit, static_argnames=("block_b",))
def mlp_classifier_forward(x, w1, b1, w2, b2, *, block_b=DEFAULT_BLOCK_B):
    """x: (B, 2) f32 -> logits (B, ACTION_N) f32.

    Params are stored (in_features, out_features): w1 (2,128), b1 (1,128),
    w2 (128,ACTION_N), b2 (1,ACTION_N), so the kernel computes x @ W + b
    (equivalent to PyTorch's x @ W.T with W of shape (out, in)).
    """
    B = x.shape[0]
    x = x.astype(jnp.float32)

    # Batch tile: multiple of 8 sublanes, capped at block_b.  Ragged grid, no padding.
    tb = min(block_b, _round_up(B, 8))
    grid = (pl.cdiv(B, tb),)

    out = pl.pallas_call(
        mlp_kernel,
        out_shape=jax.ShapeDtypeStruct((B, ACTION_N), jnp.float32),
        grid=grid,
        in_specs=[
            pl.BlockSpec((tb, IN_FEATURES), lambda i: (i, 0)),   # x tile, pipelined
            pl.BlockSpec((IN_FEATURES, HIDDEN), lambda i: (0, 0)),  # w1: resident
            pl.BlockSpec((1, HIDDEN), lambda i: (0, 0)),            # b1: resident
            pl.BlockSpec((HIDDEN, ACTION_N), lambda i: (0, 0)),     # w2: resident
            pl.BlockSpec((1, ACTION_N), lambda i: (0, 0)),          # b2: resident
        ],
        out_specs=pl.BlockSpec((tb, ACTION_N), lambda i: (i, 0)),   # narrow logits block
        compiler_params=pltpu.CompilerParams(
            dimension_semantics=("parallel",),   # shard batch tiles across TCs on v7x
        ),
    )(x, w1, b1, w2, b2)

    return out


def init_params(key):
    """Deterministic init mimicking PyTorch nn.Linear default (U(-1/sqrt(fan_in), +1/sqrt(fan_in)))."""
    k1, k2, k3, k4 = jax.random.split(key, 4)
    bound1 = 1.0 / np.sqrt(IN_FEATURES)
    bound2 = 1.0 / np.sqrt(HIDDEN)
    # Stored as (in, out) so the kernel does x @ W + b.
    w1 = jax.random.uniform(k1, (IN_FEATURES, HIDDEN), jnp.float32, -bound1, bound1)
    b1 = jax.random.uniform(k2, (1, HIDDEN), jnp.float32, -bound1, bound1)
    w2 = jax.random.uniform(k3, (HIDDEN, ACTION_N), jnp.float32, -bound2, bound2)
    b2 = jax.random.uniform(k4, (1, ACTION_N), jnp.float32, -bound2, bound2)
    return w1, b1, w2, b2


if __name__ == "__main__":
    key = jax.random.PRNGKey(0)
    kx, kp = jax.random.split(key)

    B = 8
    x = jax.random.normal(kx, (B, IN_FEATURES), jnp.float32)
    w1, b1, w2, b2 = init_params(kp)

    out = mlp_classifier_forward(x, w1, b1, w2, b2)
    out = jax.block_until_ready(out)

    # Pure-JAX reference for correctness check.
    ref = jnp.maximum(x @ w1 + b1, 0.0) @ w2 + b2
    np.testing.assert_allclose(np.asarray(out), np.asarray(ref), rtol=1e-5, atol=1e-5)

    print("KERNEL_OK")
</pallas_src>

<mosaic_0001>
module attributes {stable_mosaic.version = 11 : i64} {
  func.func @mlp_kernel(%arg0: i32, %arg1: memref<8x2xf32, #tpu.memory_space<vmem>>, %arg2: memref<2x128xf32, #tpu.memory_space<vmem>>, %arg3: memref<1x128xf32, #tpu.memory_space<vmem>>, %arg4: memref<128x4xf32, #tpu.memory_space<vmem>>, %arg5: memref<1x4xf32, #tpu.memory_space<vmem>>, %arg6: memref<8x4xf32, #tpu.memory_space<vmem>>) attributes {dimension_semantics = [#tpu.dimension_semantics<parallel>], iteration_bounds = array<i64: 1>, scalar_prefetch = 0 : i64, scratch_operands = 0 : i64, tpu.core_type = #tpu.core_type<tc>, window_params = [{transform_indices = @transform_0, window_bounds = array<i64: 8, 2>}, {pipeline_mode = #tpu.pipeline_mode<synchronous>, transform_indices = @transform_1, window_bounds = array<i64: 2, 128>}, {pipeline_mode = #tpu.pipeline_mode<synchronous>, transform_indices = @transform_2, window_bounds = array<i64: 1, 128>}, {pipeline_mode = #tpu.pipeline_mode<synchronous>, transform_indices = @transform_3, window_bounds = array<i64: 128, 4>}, {pipeline_mode = #tpu.pipeline_mode<synchronous>, transform_indices = @transform_4, window_bounds = array<i64: 1, 4>}, {transform_indices = @transform_5, window_bounds = array<i64: 8, 4>}]} {
    %c0 = arith.constant 0 : index
    %c0_0 = arith.constant 0 : index
    %0 = vector.load %arg1[%c0, %c0_0] : memref<8x2xf32, #tpu.memory_space<vmem>>, vector<8x2xf32>
    %1 = vector.extract_strided_slice %0 {offsets = [0, 0], sizes = [8, 1], strides = [1, 1]} : vector<8x2xf32> to vector<8x1xf32>
    %c0_1 = arith.constant 0 : index
    %c0_2 = arith.constant 0 : index
    %2 = vector.load %arg2[%c0_1, %c0_2] : memref<2x128xf32, #tpu.memory_space<vmem>>, vector<1x128xf32>
    %3 = vector.broadcast %1 : vector<8x1xf32> to vector<8x128xf32>
    %4 = vector.broadcast %2 : vector<1x128xf32> to vector<8x128xf32>
    %5 = arith.mulf %3, %4 : vector<8x128xf32>
    %6 = vector.extract_strided_slice %0 {offsets = [0, 1], sizes = [8, 1], strides = [1, 1]} : vector<8x2xf32> to vector<8x1xf32>
    %c1 = arith.constant 1 : index
    %c0_3 = arith.constant 0 : index
    %7 = vector.load %arg2[%c1, %c0_3] : memref<2x128xf32, #tpu.memory_space<vmem>>, vector<1x128xf32>
    %8 = vector.broadcast %6 : vector<8x1xf32> to vector<8x128xf32>
    %9 = vector.broadcast %7 : vector<1x128xf32> to vector<8x128xf32>
    %10 = arith.mulf %8, %9 : vector<8x128xf32>
    %11 = arith.addf %5, %10 : vector<8x128xf32>
    %c0_4 = arith.constant 0 : index
    %c0_5 = arith.constant 0 : index
    %12 = vector.load %arg3[%c0_4, %c0_5] : memref<1x128xf32, #tpu.memory_space<vmem>>, vector<1x128xf32>
    %13 = vector.broadcast %12 : vector<1x128xf32> to vector<8x128xf32>
    %14 = arith.addf %11, %13 : vector<8x128xf32>
    %cst = arith.constant 0.000000e+00 : f32
    %15 = vector.broadcast %cst : f32 to vector<8x128xf32>
    %16 = arith.maximumf %14, %15 : vector<8x128xf32>
    %c0_6 = arith.constant 0 : index
    %c0_7 = arith.constant 0 : index
    %17 = vector.load %arg4[%c0_6, %c0_7] : memref<128x4xf32, #tpu.memory_space<vmem>>, vector<128x4xf32>
    %cst_8 = arith.constant dense<0.000000e+00> : vector<8x4xf32>
    %18 = tpu.matmul %16, %17, %cst_8 {dimension_numbers = #tpu.dot_dimension_numbers<[1], [0], [0], [1], [0, 0, 1, 1], [], []>} : vector<8x128xf32>, vector<128x4xf32>, vector<8x4xf32> -> vector<8x4xf32>
    %c0_9 = arith.constant 0 : index
    %c0_10 = arith.constant 0 : index
    %19 = vector.load %arg5[%c0_9, %c0_10] : memref<1x4xf32, #tpu.memory_space<vmem>>, vector<1x4xf32>
    %20 = vector.broadcast %19 : vector<1x4xf32> to vector<8x4xf32>
    %21 = arith.addf %18, %20 : vector<8x4xf32>
    %c0_11 = arith.constant 0 : index
    %c0_12 = arith.constant 0 : index
    %22 = vector.load %arg6[%c0_11, %c0_12] : memref<8x4xf32, #tpu.memory_space<vmem>>, vector<8x4xf32>
    tpu.vector_store %arg6[%c0_11, %c0_12], %21 {strides = array<i32>} : memref<8x4xf32, #tpu.memory_space<vmem>>, vector<8x4xf32>,
    return
  }
  func.func @transform_0(%arg0: i32) -> (i32, i32) {
    %c0_i32 = arith.constant 0 : i32
    %c0_i32_0 = arith.constant 0 : i32
    return %arg0, %c0_i32 : i32, i32
  }
  func.func @transform_1(%arg0: i32) -> (i32, i32) {
    %c0_i32 = arith.constant 0 : i32
    %c0_i32_0 = arith.constant 0 : i32
    %c0_i32_1 = arith.constant 0 : i32
    return %c0_i32, %c0_i32_0 : i32, i32
  }
  func.func @transform_2(%arg0: i32) -> (i32, i32) {
    %c0_i32 = arith.constant 0 : i32
    %c0_i32_0 = arith.constant 0 : i32
    %c0_i32_1 = arith.constant 0 : i32
    return %c0_i32, %c0_i32_0 : i32, i32
  }
  func.func @transform_3(%arg0: i32) -> (i32, i32) {
    %c0_i32 = arith.constant 0 : i32
    %c0_i32_0 = arith.constant 0 : i32
    %c0_i32_1 = arith.constant 0 : i32
    return %c0_i32, %c0_i32_0 : i32, i32
  }
  func.func @transform_4(%arg0: i32) -> (i32, i32) {
    %c0_i32 = arith.constant 0 : i32
    %c0_i32_0 = arith.constant 0 : i32
    %c0_i32_1 = arith.constant 0 : i32
    return %c0_i32, %c0_i32_0 : i32, i32
  }
  func.func @transform_5(%arg0: i32) -> (i32, i32) {
    %c0_i32 = arith.constant 0 : i32
    %c0_i32_0 = arith.constant 0 : i32
    return %arg0, %c0_i32 : i32, i32
  }
}

</mosaic_0001>

<bundles_post_ra>
// kernel: mlp_classifier_forward.1
= control target key start
LH: loop header
LB: loop body
LE: loop exit
PB: predicated region body
PF: predicated region fallthrough
CT: control target
= control target key end

     0   :  { %v213_v0 = vmov 0   ;;  %v214_v2 = vmov 0.0   ;;  %v215_v7 = vmov 1   ;;  %vm216_vm0 = vmmov 0   ;;  %s313_s0 = inlined_call_operand.vmem [shape: f32[8,2], index: 0, kind: input, shape index: {}]   ;;  %s314_s3 = inlined_call_operand.vmem [shape: f32[128,4], index: 3, kind: input, shape index: {}]   ;;  %s315_s1 = inlined_call_operand.vmem [shape: f32[2,128], index: 1, kind: input, shape index: {}]   ;;  %s316_s2 = inlined_call_operand.vmem [shape: f32[1,128], index: 2, kind: input, shape index: {}]   ;;  %s317_s4 = inlined_call_operand.vmem [shape: f32[1,4], index: 4, kind: input, shape index: {}]   ;;  %s318_s5 = inlined_call_operand.vmem [shape: f32[8,4], index: 5, kind: output, shape index: {}]  }
   0x1   :  { %211 = vset.pattern.permute.xlu0 %v213_v0  ;;  %v20_v1 = vld [vmem:[%s313_s0] sm:$0xff]  ;;  %172 = vmatprep.subr.mxu0 %v214_v2  ;;  %v67_v3 = vld [vmem:[%s314_s3 + $0x78] sm:$0xff]  ;;  %v66_v4 = vld [vmem:[%s314_s3 + $0x70] sm:$0xff]  ;;  %vm145_vm1 = vcmask 31744  }
   0x2   :  { %24 = vperm.xlu0 %211, %v20_v1   ;;  %173 = vmatpush3.msra.mxu0 %v67_v3  ;;  %v65_v5 = vld [vmem:[%s314_s3 + $0x68] sm:$0xff]  ;;  %v64_v6 = vld [vmem:[%s314_s3 + $0x60] sm:$0xff]  ;;  %v63_v8 = vld [vmem:[%s314_s3 + $0x58] sm:$0xff] }
   0x3   :  { %174 = vmatprep.subr.mxu0 %v214_v2  ;;  %204 = vmatprep.mubr.msk.f32.mxu0 %vm216_vm0, %v214_v2  ;;  %v62_v9 = vld [vmem:[%s314_s3 + $0x50] sm:$0xff]  ;;  %v61_v10 = vld [vmem:[%s314_s3 + $0x48] sm:$0xff]  ;;  %v60_v11 = vld [vmem:[%s314_s3 + $0x40] sm:$0xff] }
   0x4   :  { %175 = vmatpush3.msra.mxu0 %v66_v4  ;;  %v59_v12 = vld [vmem:[%s314_s3 + $0x38] sm:$0xff]  ;;  %v58_v13 = vld [vmem:[%s314_s3 + $0x30] sm:$0xff]  ;;  %v57_v14 = vld [vmem:[%s314_s3 + $0x28] sm:$0xff] }
   0x5   :  { %176 = vmatprep.subr.mxu0 %v214_v2  ;;  %v56_v15 = vld [vmem:[%s314_s3 + $0x20] sm:$0xff]  ;;  %v55_v16 = vld [vmem:[%s314_s3 + $0x18] sm:$0xff]  ;;  %v54_v17 = vld [vmem:[%s314_s3 + $0x10] sm:$0xff] }
   0x6   :  { %212 = vset.pattern.permute.xlu0 %v215_v7  ;;  %177 = vmatpush3.msra.mxu0 %v65_v5  ;;  %v53_v18 = vld [vmem:[%s314_s3 + $0x8] sm:$0xff]  ;;  %v52_v19 = vld [vmem:[%s314_s3] sm:$0xff] }
   0x7   :  { %34 = vperm.xlu0 %212, %v20_v1   ;;  %178 = vmatprep.subr.mxu0 %v214_v2  ;;  %v151_v21 = vld [vmem:[%s315_s1] ss:$0 sm:$0xff]  ;;  %v152_v22 = vld [vmem:[%s315_s1 + $0x1] ss:$0 sm:$0xff] }
   0x8   :  { %179 = vmatpush3.msra.mxu0 %v64_v6  ;;  %v153_v26 = vld [vmem:[%s316_s2] ss:$0 sm:$0xff] }
   0x9   :  { %180 = vmatprep.subr.mxu0 %v214_v2  ;;  %v154_v30 = vld [vmem:[%s317_s4] ss:$0 sm:$0xff] }
   0xa   :  { %181 = vmatpush3.msra.mxu0 %v63_v8 }
   0xb   :  { %182 = vmatprep.subr.mxu0 %v214_v2 }
   0xc   :  { %183 = vmatpush3.msra.mxu0 %v62_v9 }
   0xd   :  { %184 = vmatprep.subr.mxu0 %v214_v2 }
   0xe   :  { %185 = vmatpush3.msra.mxu0 %v61_v10 }
   0xf   :  { %186 = vmatprep.subr.mxu0 %v214_v2 }
  0x10   :  { %187 = vmatpush3.msra.mxu0 %v60_v11 }
  0x11   :  { %188 = vmatprep.subr.mxu0 %v214_v2 }
  0x12   :  { %189 = vmatpush3.msra.mxu0 %v59_v12 }
  0x13   :  { %190 = vmatprep.subr.mxu0 %v214_v2 }
  0x14   :  { %191 = vmatpush3.msra.mxu0 %v58_v13 }
  0x15   :  { %192 = vmatprep.subr.mxu0 %v214_v2 }
  0x16   :  { %193 = vmatpush3.msra.mxu0 %v57_v14 }
  0x17   :  { %194 = vmatprep.subr.mxu0 %v214_v2 }
  0x18   :  { %195 = vmatpush3.msra.mxu0 %v56_v15 }
  0x19   :  { %196 = vmatprep.subr.mxu0 %v214_v2 }
  0x1a   :  { %197 = vmatpush3.msra.mxu0 %v55_v16 }
  0x1b   :  { %198 = vmatprep.subr.mxu0 %v214_v2 }
  0x1c   :  { %199 = vmatpush3.msra.mxu0 %v54_v17 }
  0x1d   :  { %200 = vmatprep.subr.mxu0 %v214_v2 }
  0x1e   :  { %201 = vmatpush3.msra.mxu0 %v53_v18 }
  0x1f   :  { %202 = vmatprep.subr.mxu0 %v214_v2 }
  0x20   :  { %203 = vmatpush3.msra.mxu0 %v52_v19 }
  0x7d   :  { %v25_v20 = vpop.permute.xlu0 %24 }
  0x7e   :  { %v31_v24 = vmul.f32 %v151_v21, %v25_v20 }
  0x82   :  { %v35_v23 = vpop.permute.xlu0 %34 }
  0x83   :  { %v41_v25 = vmul.f32 %v152_v22, %v35_v23 }
  0x85   :  { %v42_v27 = vadd.f32 %v41_v25, %v31_v24 }
  0x87   :  { %v50_v28 = vadd.f32 %v153_v26, %v42_v27 }
  0x89   :  { %v51_v29 = vmax.f32 %v50_v28, 0.0 }
  0x8b   :  { %205 = vmatmul.mubr.f32.vlgmr.msra.gmra.mxu0 %v51_v29 }
 0x14b   :  { %v141_v31 = vpop.f32.mrf.mxu0 }
 0x14c   :  { %v142_v32 = vadd.f32 %v154_v30, %v141_v31 }
 0x14d   :  { %v206_v33 = vpop.f32.mrf.mxu0 }
 0x14e   :  { %146 = vst.msk [vmem:[%s318_s5] sm:$0xff] %vm145_vm1, %v142_v32 }

</bundles_post_ra>
